<compile_context>
chip_gen: v5e
topology: v5e:2x2
jax: 0.10.0
libtpu: 0.0.40
codegen_flags: <defaults>
</compile_context>

<pallas_src>
import functools

import jax
import jax.numpy as jnp
from jax.experimental import pallas as pl
from jax.experimental.pallas import tpu as pltpu


def _round_up(n, m):
    return ((n + m - 1) // m) * m


def encoder_kernel(x_ref, w1_ref, b1_ref, w2_ref, b2_ref, o_ref):
    # Linear -> ReLU -> Linear. Cast x to the compute dtype (= weights' dtype)
    # in VMEM (free vs. HBM); MXU matmuls accumulate in f32; the bias/ReLU
    # epilogue stays in f32 on the accumulator.
    x = x_ref[...].astype(w1_ref.dtype)
    h = jnp.dot(x, w1_ref[...], preferred_element_type=jnp.float32)
    h = jnp.maximum(h + b1_ref[...], 0.0)
    h = h.astype(w2_ref.dtype)  # feed second matmul at the compute dtype
    out = jnp.dot(h, w2_ref[...], preferred_element_type=jnp.float32) + b2_ref[...]
    o_ref[...] = out.astype(o_ref.dtype)


def prepare_encoder_params(w1, b1, w2, b2, *, compute_dtype=None):
    """One-time parameter prep (hoisted out of the per-call path).

    Weights are cast to the compute dtype (f32 default, bf16 for the fast
    path); biases are reshaped to (1, N) f32 rows since the epilogue always
    runs in f32 on the f32 MXU accumulator.
    """
    cdt = jnp.dtype(compute_dtype) if compute_dtype is not None else jnp.dtype(w1.dtype)
    w1p = jnp.asarray(w1, cdt)
    w2p = jnp.asarray(w2, cdt)
    b1p = jnp.asarray(b1, jnp.float32).reshape(1, -1)
    b2p = jnp.asarray(b2, jnp.float32).reshape(1, -1)
    return w1p, b1p, w2p, b2p


def _choose_tb(batch, block_batch):
    """Batch tile: multiple of 8 (or the full batch). Target >=4 grid steps
    for large batches so the 'parallel' axis shards across both v7x TCs,
    capped at block_batch rows to bound VMEM / lengthen DMAs."""
    if batch <= 8:
        return batch
    tb = min(block_batch, _round_up(pl.cdiv(batch, 4), 8))
    if tb >= batch:
        return batch
    return tb


@functools.partial(jax.jit, static_argnames=("block_batch",))
def encoder_forward(x, w1, b1, w2, b2, block_batch=4096):
    """x: [B, in] (f32 or bf16); w1: [in, hid]; b1: [1, hid] f32;
    w2: [hid, lat]; b2: [1, lat] f32. Weights define the compute dtype."""
    batch, input_dim = x.shape
    hidden = w1.shape[1]
    latent = w2.shape[1]
    out_dtype = x.dtype

    tb = _choose_tb(batch, block_batch)
    grid = (pl.cdiv(batch, tb),)

    x_item = jnp.dtype(x.dtype).itemsize
    w_item = jnp.dtype(w1.dtype).itemsize
    o_item = jnp.dtype(out_dtype).itemsize
    cost = pl.CostEstimate(
        flops=2 * batch * (input_dim * hidden + hidden * latent),
        transcendentals=0,
        bytes_accessed=(batch * (input_dim * x_item + latent * o_item)
                        + (input_dim * hidden + hidden * latent) * w_item
                        + (hidden + latent) * 4),
    )

    return pl.pallas_call(
        encoder_kernel,
        out_shape=jax.ShapeDtypeStruct((batch, latent), out_dtype),
        grid=grid,
        in_specs=[
            pl.BlockSpec((tb, input_dim), lambda i: (i, 0)),      # x: streamed, unpadded
            pl.BlockSpec((input_dim, hidden), lambda i: (0, 0)),  # w1: resident
            pl.BlockSpec((1, hidden), lambda i: (0, 0)),          # b1: resident
            pl.BlockSpec((hidden, latent), lambda i: (0, 0)),     # w2: resident
            pl.BlockSpec((1, latent), lambda i: (0, 0)),          # b2: resident
        ],
        out_specs=pl.BlockSpec((tb, latent), lambda i: (i, 0)),   # out: unpadded
        compiler_params=pltpu.CompilerParams(
            dimension_semantics=("parallel",),
        ),
        cost_estimate=cost,
    )(x, w1, b1, w2, b2)


def init_encoder_params(key, input_dim=40, hidden_neus=27, latent_dim=7,
                        dtype=jnp.float32):
    """Matches Encoder.init_params: weight ~ U(-1/sqrt(in), 1/sqrt(in)), bias = 0."""
    k1, k2 = jax.random.split(key)
    bound1 = 1.0 / jnp.sqrt(jnp.asarray(input_dim, dtype))
    bound2 = 1.0 / jnp.sqrt(jnp.asarray(hidden_neus, dtype))
    # Stored transposed relative to PyTorch (in, out) so the kernel computes x @ W.
    w1 = jax.random.uniform(k1, (input_dim, hidden_neus), dtype,
                            minval=-bound1, maxval=bound1)
    b1 = jnp.zeros((1, hidden_neus), dtype)
    w2 = jax.random.uniform(k2, (hidden_neus, latent_dim), dtype,
                            minval=-bound2, maxval=bound2)
    b2 = jnp.zeros((1, latent_dim), dtype)
    return w1, b1, w2, b2


if __name__ == "__main__":
    key = jax.random.PRNGKey(0)
    kx, kp, kx2 = jax.random.split(key, 3)

    batch, input_dim, hidden_neus, latent_dim = 8, 40, 27, 7
    x = jax.random.normal(kx, (batch, input_dim), jnp.float32)
    w1, b1, w2, b2 = init_encoder_params(kp, input_dim, hidden_neus, latent_dim)

    # pure-JAX reference
    ref = jnp.maximum(x @ w1 + b1, 0.0) @ w2 + b2

    # f32 path (params prepared once, outside the per-call path; exact vs ref)
    p_f32 = prepare_encoder_params(w1, b1, w2, b2)
    out = jax.block_until_ready(encoder_forward(x, *p_f32))
    assert out.shape == (batch, latent_dim)
    assert jnp.allclose(out, ref, atol=1e-5, rtol=1e-5)

    # bf16 fast path: bf16 weights prepared once; x stays f32 in HBM and is
    # cast inside the kernel (zero extra HBM traffic). ~1e-2 rel error expected.
    p_bf16 = prepare_encoder_params(w1, b1, w2, b2, compute_dtype=jnp.bfloat16)
    out_bf16 = jax.block_until_ready(encoder_forward(x, *p_bf16))
    assert out_bf16.shape == (batch, latent_dim)
    assert jnp.allclose(out_bf16, ref, atol=1e-1, rtol=1e-1)

    # Larger batch: multi-tile pipelined grid (>=4 steps so both v7x TCs work),
    # exercises a partial last batch tile (OOB rows dropped by Pallas).
    xb = jax.random.normal(kx2, (1000, input_dim), jnp.float32)
    refb = jnp.maximum(xb @ w1 + b1, 0.0) @ w2 + b2
    outb = jax.block_until_ready(encoder_forward(xb, *p_f32))
    assert outb.shape == (1000, latent_dim)
    assert jnp.allclose(outb, refb, atol=1e-5, rtol=1e-5)

    print("KERNEL_OK")
</pallas_src>

<mosaic_0001>
module attributes {stable_mosaic.version = 11 : i64} {
  func.func @encoder_kernel(%arg0: i32, %arg1: memref<8x40xf32, #tpu.memory_space<vmem>>, %arg2: memref<40x27xf32, #tpu.memory_space<vmem>>, %arg3: memref<1x27xf32, #tpu.memory_space<vmem>>, %arg4: memref<27x7xf32, #tpu.memory_space<vmem>>, %arg5: memref<1x7xf32, #tpu.memory_space<vmem>>, %arg6: memref<8x7xf32, #tpu.memory_space<vmem>>) attributes {dimension_semantics = [#tpu.dimension_semantics<parallel>], iteration_bounds = array<i64: 1>, scalar_prefetch = 0 : i64, scratch_operands = 0 : i64, tpu.core_type = #tpu.core_type<tc>, window_params = [{transform_indices = @transform_0, window_bounds = array<i64: 8, 40>}, {pipeline_mode = #tpu.pipeline_mode<synchronous>, transform_indices = @transform_1, window_bounds = array<i64: 40, 27>}, {pipeline_mode = #tpu.pipeline_mode<synchronous>, transform_indices = @transform_2, window_bounds = array<i64: 1, 27>}, {pipeline_mode = #tpu.pipeline_mode<synchronous>, transform_indices = @transform_3, window_bounds = array<i64: 27, 7>}, {pipeline_mode = #tpu.pipeline_mode<synchronous>, transform_indices = @transform_4, window_bounds = array<i64: 1, 7>}, {transform_indices = @transform_5, window_bounds = array<i64: 8, 7>}]} {
    %c0 = arith.constant 0 : index
    %c0_0 = arith.constant 0 : index
    %0 = vector.load %arg1[%c0, %c0_0] : memref<8x40xf32, #tpu.memory_space<vmem>>, vector<8x40xf32>
    %c0_1 = arith.constant 0 : index
    %c0_2 = arith.constant 0 : index
    %1 = vector.load %arg2[%c0_1, %c0_2] : memref<40x27xf32, #tpu.memory_space<vmem>>, vector<40x27xf32>
    %cst = arith.constant dense<0.000000e+00> : vector<8x27xf32>
    %2 = tpu.matmul %0, %1, %cst {dimension_numbers = #tpu.dot_dimension_numbers<[1], [0], [0], [1], [0, 0, 1, 1], [], []>} : vector<8x40xf32>, vector<40x27xf32>, vector<8x27xf32> -> vector<8x27xf32>
    %c0_3 = arith.constant 0 : index
    %c0_4 = arith.constant 0 : index
    %3 = vector.load %arg3[%c0_3, %c0_4] : memref<1x27xf32, #tpu.memory_space<vmem>>, vector<1x27xf32>
    %4 = vector.broadcast %3 : vector<1x27xf32> to vector<8x27xf32>
    %5 = arith.addf %2, %4 : vector<8x27xf32>
    %cst_5 = arith.constant 0.000000e+00 : f32
    %6 = vector.broadcast %cst_5 : f32 to vector<8x27xf32>
    %7 = arith.maximumf %5, %6 : vector<8x27xf32>
    %c0_6 = arith.constant 0 : index
    %c0_7 = arith.constant 0 : index
    %8 = vector.load %arg4[%c0_6, %c0_7] : memref<27x7xf32, #tpu.memory_space<vmem>>, vector<27x7xf32>
    %cst_8 = arith.constant dense<0.000000e+00> : vector<8x7xf32>
    %9 = tpu.matmul %7, %8, %cst_8 {dimension_numbers = #tpu.dot_dimension_numbers<[1], [0], [0], [1], [0, 0, 1, 1], [], []>} : vector<8x27xf32>, vector<27x7xf32>, vector<8x7xf32> -> vector<8x7xf32>
    %c0_9 = arith.constant 0 : index
    %c0_10 = arith.constant 0 : index
    %10 = vector.load %arg5[%c0_9, %c0_10] : memref<1x7xf32, #tpu.memory_space<vmem>>, vector<1x7xf32>
    %11 = vector.broadcast %10 : vector<1x7xf32> to vector<8x7xf32>
    %12 = arith.addf %9, %11 : vector<8x7xf32>
    %c0_11 = arith.constant 0 : index
    %c0_12 = arith.constant 0 : index
    %13 = vector.load %arg6[%c0_11, %c0_12] : memref<8x7xf32, #tpu.memory_space<vmem>>, vector<8x7xf32>
    tpu.vector_store %arg6[%c0_11, %c0_12], %12 {strides = array<i32>} : memref<8x7xf32, #tpu.memory_space<vmem>>, vector<8x7xf32>,
    return
  }
  func.func @transform_0(%arg0: i32) -> (i32, i32) {
    %c0_i32 = arith.constant 0 : i32
    %c0_i32_0 = arith.constant 0 : i32
    return %arg0, %c0_i32 : i32, i32
  }
  func.func @transform_1(%arg0: i32) -> (i32, i32) {
    %c0_i32 = arith.constant 0 : i32
    %c0_i32_0 = arith.constant 0 : i32
    %c0_i32_1 = arith.constant 0 : i32
    return %c0_i32, %c0_i32_0 : i32, i32
  }
  func.func @transform_2(%arg0: i32) -> (i32, i32) {
    %c0_i32 = arith.constant 0 : i32
    %c0_i32_0 = arith.constant 0 : i32
    %c0_i32_1 = arith.constant 0 : i32
    return %c0_i32, %c0_i32_0 : i32, i32
  }
  func.func @transform_3(%arg0: i32) -> (i32, i32) {
    %c0_i32 = arith.constant 0 : i32
    %c0_i32_0 = arith.constant 0 : i32
    %c0_i32_1 = arith.constant 0 : i32
    return %c0_i32, %c0_i32_0 : i32, i32
  }
  func.func @transform_4(%arg0: i32) -> (i32, i32) {
    %c0_i32 = arith.constant 0 : i32
    %c0_i32_0 = arith.constant 0 : i32
    %c0_i32_1 = arith.constant 0 : i32
    return %c0_i32, %c0_i32_0 : i32, i32
  }
  func.func @transform_5(%arg0: i32) -> (i32, i32) {
    %c0_i32 = arith.constant 0 : i32
    %c0_i32_0 = arith.constant 0 : i32
    return %arg0, %c0_i32 : i32, i32
  }
}

</mosaic_0001>

<bundles_post_ra>
// kernel: encoder_forward.1
= control target key start
LH: loop header
LB: loop body
LE: loop exit
PB: predicated region body
PF: predicated region fallthrough
CT: control target
= control target key end

     0   :  { %vm68_vm0 = vcmask 1042432   ;;  %s212_s0 = inlined_call_operand.vmem [shape: f32[8,40], index: 0, kind: input, shape index: {}]   ;;  %s213_s1 = inlined_call_operand.vmem [shape: f32[40,27], index: 1, kind: input, shape index: {}]   ;;  %s214_s2 = inlined_call_operand.vmem [shape: f32[1,27], index: 2, kind: input, shape index: {}]   ;;  %s215_s3 = inlined_call_operand.vmem [shape: f32[27,7], index: 3, kind: input, shape index: {}]   ;;  %s216_s4 = inlined_call_operand.vmem [shape: f32[1,7], index: 4, kind: input, shape index: {}]   ;;  %s217_s5 = inlined_call_operand.hbm [shape: f32[8,7], index: 5, kind: output, shape index: {}]  }
   0x1   :  { %v26_v0 = vld [vmem:[%s213_s1 + $0x20] sm:$0xff]  ;;  %v25_v1 = vld [vmem:[%s213_s1 + $0x18] sm:$0xff]  ;;  %v24_v2 = vld [vmem:[%s213_s1 + $0x10] sm:$0xff] }
   0x2   :  { %46 = vmatpush.msra.mxu0 %v26_v0  ;;  %v59_v3 = vld [vmem:[%s215_s3 + $0x18] sm:$0x7] }
   0x3   :  { %111 = vmatpush.msk.msra.mxu1 %vm68_vm0, %v59_v3 }
   0x4   :  { %47 = vmatpush.msra.mxu0 %v25_v1 }
   0x5   :  { %10 = vsyncpa [#allocation3], 0  ;;  %v23_v4 = vld [vmem:[%s213_s1 + $0x8] sm:$0xff]  ;;  %v22_v5 = vld [vmem:[%s213_s1] sm:$0xff]  ;;  %vm31_vm1 = vcmask 326656   ;;  %vm64_vm2 = vcmask 220160  }
   0x6   :  { %48 = vmatpush.msra.mxu0 %v24_v2  ;;  %v21_v6 = vld [vmem:[%s212_s0] sm:$0xff]  ;;  %v58_v7 = vld [vmem:[%s215_s3 + $0x10] sm:$0xff]  ;;  %v57_v8 = vld [vmem:[%s215_s3 + $0x8] sm:$0xff]  ;;  %s142_s15 = smov [#allocation2]   ;;  %vm92_vm3 = vcmask 56320  }
   0x7   :  { %85 = vmatpush.msra.mxu1 %v58_v7  ;;  %v56_v9 = vld [vmem:[%s215_s3] sm:$0xff]  ;;  %s99_s16 = sshll.u32 %s142_s15, 4  ;;  %s101_s3 = sshll.u32 %s217_s5, 4  ;;  %s100_s16 = int_to_ptr.vmem [resolvable:$true] %s99_s16  ;;  %s102_s3 = int_to_ptr.hbm [resolvable:$true] %s101_s3 }
   0x8   :  { %49 = vmatpush.msra.mxu0 %v23_v4  ;;  %v114_v10 = vld [vmem:[%s214_s2] ss:$0 sm:$0xff] }
   0x9   :  { %86 = vmatpush.msra.mxu1 %v57_v8  ;;  %v115_v14 = vld [vmem:[%s216_s4] ss:$0 sm:$0xff] }
   0xa   :  { %50 = vmatpush.msra.mxu0 %v22_v5 }
   0xb   :  { %110 = vmatmul.msk.f32.vlgmr.msra.gmra.mxu0 %vm31_vm1, %v21_v6  ;;  %87 = vmatpush.msra.mxu1 %v56_v9 }
  0x88   :  { %v52_v11 = vpop.f32.mrf.mxu0 }
  0x89   :  { %v53_v12 = vadd.f32 %v114_v10, %v52_v11 }
  0x8b   :  { %v55_v13 = vmax.f32 %v53_v12, 0.0 }
  0x8d   :  { %112 = vmatmul.msk.f32.vlgmr.msra.gmra.mxu1 %vm64_vm2, %v55_v13 }
 0x10a   :  { %v89_v15 = vpop.f32.mrf.mxu1 }
 0x10b   :  { %v90_v16 = vadd.f32 %v115_v14, %v89_v15 }
 0x10d   :  { %93 = vst.msk [vmem:[#allocation2] sm:$0xff] %vm92_vm3, %v90_v16 }
 0x10e   :  { %104 = dma.vmem_to_hbm [thread:$0]  %s100_s16, 128, %s102_s3, [#allocation3]  }
 0x10f   :  { %140 = dma.done.wait [#allocation3], 128  }
 0x110   :  { %141 = vsyncadd [#allocation3], 4294967168 }
 0x111   :  { %109 = vsyncpa [#allocation3], 1 }

</bundles_post_ra>
